<compile_context>
chip_gen: v5e
topology: v5e:2x2
jax: 0.10.0
libtpu: 0.0.40
codegen_flags: <defaults>
</compile_context>

<pallas_src>
import functools

import jax
import jax.numpy as jnp
from jax.experimental import pallas as pl
from jax.experimental.pallas import tpu as pltpu


def _make_stack_kernel(num_hidden, last_func):
    """Kernel computing the whole fused layer stack on one (C_in, TM) tile."""

    def kernel(x_ref, *refs):
        o_ref = refs[-1]
        p = refs[:-1]
        h = x_ref[...].astype(jnp.float32)           # (c_in, tm)
        idx = 0
        # hidden layers: pointwise conv (+ fused BN folded into W/b) + ReLU
        for _ in range(num_hidden):
            w = p[idx][...]                          # (c_out, c_in)
            b = p[idx + 1][...]                      # (c_out, 1) -> lanes bcast
            h = jnp.dot(w, h, preferred_element_type=jnp.float32) + b
            h = jnp.maximum(h, 0.0)
            idx += 2
        # final conv (no ReLU)
        w = p[idx][...]
        b = p[idx + 1][...]
        h = jnp.dot(w, h, preferred_element_type=jnp.float32) + b
        if last_func == "sigmoid":
            h = jax.nn.sigmoid(h)
        # TODO(synk): last_func other than None/Sigmoid is not supported.
        o_ref[...] = h.astype(o_ref.dtype)

    return kernel


def init_params(key, features, bn, dtype=jnp.float32):
    """Deterministic synthetic parameters with PyTorch-style shapes.

    Per layer l (features[l] -> features[l+1]):
      weight (c_out, c_in)  -- Conv3d weight (Cout, Cin, 1, 1, 1) squeezed
      bias   (c_out,)
      if bn and not last: gamma, beta, running_mean, running_var  (c_out,)
    """
    params = []
    n_layers = len(features) - 1
    for l in range(n_layers):
        cin, cout = features[l], features[l + 1]
        key, kw, kb, kg, kbt, km, kv = jax.random.split(key, 7)
        w = jax.random.normal(kw, (cout, cin), dtype) / jnp.sqrt(
            jnp.float32(cin)).astype(dtype)
        b = jax.random.normal(kb, (cout,), dtype) * 0.1
        is_last = l == n_layers - 1
        if bn and not is_last:
            gamma = jax.random.uniform(kg, (cout,), dtype, 0.5, 1.5)
            beta = jax.random.normal(kbt, (cout,), dtype) * 0.1
            rmean = jax.random.normal(km, (cout,), dtype) * 0.1
            rvar = jax.random.uniform(kv, (cout,), dtype, 0.5, 1.5)
            params.append((w, b, gamma, beta, rmean, rvar))
        else:
            params.append((w, b))
    return params


def fuse_params(params, bn, eps=1e-5):
    """Fold eval-mode BatchNorm into each conv's weight/bias.

    y = ((W x + b) - mean) / sqrt(var+eps) * gamma + beta
      = (W * s) x + (b * s + t),   s = gamma/sqrt(var+eps),  t = beta - mean*s
    Returns list of (W (c_out, c_in), b (c_out, 1))."""
    fused = []
    for layer in params:
        w, b = layer[0], layer[1]
        if bn and len(layer) == 6:
            gamma, beta, rmean, rvar = layer[2], layer[3], layer[4], layer[5]
            s = gamma / jnp.sqrt(rvar + eps)
            t = beta - rmean * s
            w = w * s[:, None]
            b = b * s + t
        fused.append((w, b[:, None]))
    return fused


@functools.partial(jax.jit, static_argnames=("last_func",))
def conv_3d_forward(x, fused_params, *, last_func=None):
    """Forward pass of the conv_3d stack.  x: (N, C, D, H, W) float32."""
    n, c_in, d, h, w = x.shape
    c_out = fused_params[-1][0].shape[0]
    m = d * h * w

    # Spatial (lane) tile: multiple of 128, capped at 2048 for VMEM headroom
    # (intermediate (32, 2048) f32 is only 256 KiB; fine on v7x's 64 MiB VMEM).
    tm = min(2048, pl.cdiv(m, 128) * 128)
    m_pad = pl.cdiv(m, tm) * tm

    x3 = x.reshape(n, c_in, m)                       # NCDHW -> (N, C, M): no transpose
    if m_pad != m:
        x3 = jnp.pad(x3, ((0, 0), (0, 0), (0, m_pad - m)))

    num_hidden = len(fused_params) - 1
    kernel = _make_stack_kernel(num_hidden, last_func)

    flat_params = []
    in_specs = [pl.BlockSpec((None, c_in, tm), lambda nb, i: (nb, 0, i))]
    for w_l, b_l in fused_params:
        # params are tiny; keep each one whole and resident in VMEM
        flat_params.append(w_l)
        in_specs.append(pl.BlockSpec(w_l.shape, lambda nb, i: (0, 0)))
        flat_params.append(b_l)
        in_specs.append(pl.BlockSpec(b_l.shape, lambda nb, i: (0, 0)))

    out = pl.pallas_call(
        kernel,
        out_shape=jax.ShapeDtypeStruct((n, c_out, m_pad), x.dtype),
        grid_spec=pltpu.PrefetchScalarGridSpec(
            num_scalar_prefetch=0,
            grid=(n, m_pad // tm),
            in_specs=in_specs,
            out_specs=pl.BlockSpec((None, c_out, tm), lambda nb, i: (nb, 0, i)),
        ),
        compiler_params=pltpu.CompilerParams(
            dimension_semantics=("parallel", "parallel")),
    )(x3, *flat_params)

    return out[:, :, :m].reshape(n, c_out, d, h, w)  # back to NCDHW: no transpose


def _reference_forward(x, params, bn, last_func=None, eps=1e-5):
    """Plain-JAX reference using the RAW (unfused) params."""
    n, c_in, d, h, w = x.shape
    m = d * h * w
    act = x.reshape(n, c_in, m).astype(jnp.float32)
    num_hidden = len(params) - 1
    for l in range(num_hidden):
        layer = params[l]
        wl, bl = layer[0], layer[1]
        act = jnp.einsum("oc,ncm->nom", wl, act) + bl[None, :, None]
        if bn:
            gamma, beta, rmean, rvar = layer[2], layer[3], layer[4], layer[5]
            act = (act - rmean[None, :, None]) / jnp.sqrt(
                rvar + eps)[None, :, None] * gamma[None, :, None] + beta[None, :, None]
        act = jnp.maximum(act, 0.0)
    wl, bl = params[-1]
    act = jnp.einsum("oc,ncm->nom", wl, act) + bl[None, :, None]
    if last_func == "sigmoid":
        act = jax.nn.sigmoid(act)
    c_out = wl.shape[0]
    return act.reshape(n, c_out, d, h, w).astype(x.dtype)


if __name__ == "__main__":
    # conv_3d(features=[4, 16, 32, 8], bn=True, last_func=None)
    features = [4, 16, 32, 8]
    bn = True

    key = jax.random.PRNGKey(0)
    key, kx = jax.random.split(key)
    # (N, C, D, H, W) — PyTorch NCDHW convention
    x = jax.random.normal(kx, (2, features[0], 4, 8, 8), jnp.float32)

    params = init_params(key, features, bn)
    fused = fuse_params(params, bn)

    out = conv_3d_forward(x, fused, last_func=None)
    out = jax.block_until_ready(out)

    ref = _reference_forward(x, params, bn, last_func=None)
    assert out.shape == (2, features[-1], 4, 8, 8), out.shape
    assert jnp.allclose(out, ref, atol=1e-4, rtol=1e-4), "mismatch vs reference"

    print("KERNEL_OK")
</pallas_src>

<mosaic_0001>
module attributes {stable_mosaic.version = 11 : i64} {
  func.func @kernel(%arg0: i32, %arg1: i32, %arg2: memref<1x4x256xf32, #tpu.memory_space<vmem>>, %arg3: memref<16x4xf32, #tpu.memory_space<vmem>>, %arg4: memref<16x1xf32, #tpu.memory_space<vmem>>, %arg5: memref<32x16xf32, #tpu.memory_space<vmem>>, %arg6: memref<32x1xf32, #tpu.memory_space<vmem>>, %arg7: memref<8x32xf32, #tpu.memory_space<vmem>>, %arg8: memref<8x1xf32, #tpu.memory_space<vmem>>, %arg9: memref<1x8x256xf32, #tpu.memory_space<vmem>>) attributes {dimension_semantics = [#tpu.dimension_semantics<parallel>, #tpu.dimension_semantics<parallel>], iteration_bounds = array<i64: 2, 1>, scalar_prefetch = 0 : i64, scratch_operands = 0 : i64, tpu.core_type = #tpu.core_type<tc>, window_params = [{transform_indices = @transform_0, window_bounds = array<i64: 1, 4, 256>}, {pipeline_mode = #tpu.pipeline_mode<synchronous>, transform_indices = @transform_1, window_bounds = array<i64: 16, 4>}, {pipeline_mode = #tpu.pipeline_mode<synchronous>, transform_indices = @transform_2, window_bounds = array<i64: 16, 1>}, {pipeline_mode = #tpu.pipeline_mode<synchronous>, transform_indices = @transform_3, window_bounds = array<i64: 32, 16>}, {pipeline_mode = #tpu.pipeline_mode<synchronous>, transform_indices = @transform_4, window_bounds = array<i64: 32, 1>}, {pipeline_mode = #tpu.pipeline_mode<synchronous>, transform_indices = @transform_5, window_bounds = array<i64: 8, 32>}, {pipeline_mode = #tpu.pipeline_mode<synchronous>, transform_indices = @transform_6, window_bounds = array<i64: 8, 1>}, {transform_indices = @transform_7, window_bounds = array<i64: 1, 8, 256>}]} {
    %c0 = arith.constant 0 : index
    %c0_0 = arith.constant 0 : index
    %c0_1 = arith.constant 0 : index
    %0 = vector.load %arg2[%c0, %c0_0, %c0_1] : memref<1x4x256xf32, #tpu.memory_space<vmem>>, vector<1x4x256xf32>
    %1 = vector.shape_cast %0 : vector<1x4x256xf32> to vector<4x256xf32>
    %c0_2 = arith.constant 0 : index
    %c0_3 = arith.constant 0 : index
    %2 = vector.load %arg3[%c0_2, %c0_3] : memref<16x4xf32, #tpu.memory_space<vmem>>, vector<16x4xf32>
    %c0_4 = arith.constant 0 : index
    %c0_5 = arith.constant 0 : index
    %3 = vector.load %arg4[%c0_4, %c0_5] : memref<16x1xf32, #tpu.memory_space<vmem>>, vector<16x1xf32>
    %cst = arith.constant dense<0.000000e+00> : vector<16x256xf32>
    %4 = tpu.matmul %2, %1, %cst {dimension_numbers = #tpu.dot_dimension_numbers<[1], [0], [0], [1], [0, 0, 1, 1], [], []>} : vector<16x4xf32>, vector<4x256xf32>, vector<16x256xf32> -> vector<16x256xf32>
    %5 = vector.broadcast %3 : vector<16x1xf32> to vector<16x256xf32>
    %6 = arith.addf %4, %5 : vector<16x256xf32>
    %cst_6 = arith.constant 0.000000e+00 : f32
    %7 = vector.broadcast %cst_6 : f32 to vector<16x256xf32>
    %8 = arith.maximumf %6, %7 : vector<16x256xf32>
    %c0_7 = arith.constant 0 : index
    %c0_8 = arith.constant 0 : index
    %9 = vector.load %arg5[%c0_7, %c0_8] : memref<32x16xf32, #tpu.memory_space<vmem>>, vector<32x16xf32>
    %c0_9 = arith.constant 0 : index
    %c0_10 = arith.constant 0 : index
    %10 = vector.load %arg6[%c0_9, %c0_10] : memref<32x1xf32, #tpu.memory_space<vmem>>, vector<32x1xf32>
    %cst_11 = arith.constant dense<0.000000e+00> : vector<32x256xf32>
    %11 = tpu.matmul %9, %8, %cst_11 {dimension_numbers = #tpu.dot_dimension_numbers<[1], [0], [0], [1], [0, 0, 1, 1], [], []>} : vector<32x16xf32>, vector<16x256xf32>, vector<32x256xf32> -> vector<32x256xf32>
    %12 = vector.broadcast %10 : vector<32x1xf32> to vector<32x256xf32>
    %13 = arith.addf %11, %12 : vector<32x256xf32>
    %cst_12 = arith.constant 0.000000e+00 : f32
    %14 = vector.broadcast %cst_12 : f32 to vector<32x256xf32>
    %15 = arith.maximumf %13, %14 : vector<32x256xf32>
    %c0_13 = arith.constant 0 : index
    %c0_14 = arith.constant 0 : index
    %16 = vector.load %arg7[%c0_13, %c0_14] : memref<8x32xf32, #tpu.memory_space<vmem>>, vector<8x32xf32>
    %c0_15 = arith.constant 0 : index
    %c0_16 = arith.constant 0 : index
    %17 = vector.load %arg8[%c0_15, %c0_16] : memref<8x1xf32, #tpu.memory_space<vmem>>, vector<8x1xf32>
    %cst_17 = arith.constant dense<0.000000e+00> : vector<8x256xf32>
    %18 = tpu.matmul %16, %15, %cst_17 {dimension_numbers = #tpu.dot_dimension_numbers<[1], [0], [0], [1], [0, 0, 1, 1], [], []>} : vector<8x32xf32>, vector<32x256xf32>, vector<8x256xf32> -> vector<8x256xf32>
    %19 = vector.broadcast %17 : vector<8x1xf32> to vector<8x256xf32>
    %20 = arith.addf %18, %19 : vector<8x256xf32>
    %c0_18 = arith.constant 0 : index
    %c0_19 = arith.constant 0 : index
    %c0_20 = arith.constant 0 : index
    %21 = vector.load %arg9[%c0_18, %c0_19, %c0_20] : memref<1x8x256xf32, #tpu.memory_space<vmem>>, vector<1x8x256xf32>
    %22 = vector.shape_cast %21 : vector<1x8x256xf32> to vector<8x256xf32>
    %23 = vector.shape_cast %20 : vector<8x256xf32> to vector<1x8x256xf32>
    tpu.vector_store %arg9[%c0_18, %c0_19, %c0_20], %23 {strides = array<i32>} : memref<1x8x256xf32, #tpu.memory_space<vmem>>, vector<1x8x256xf32>,
    return
  }
  func.func @transform_0(%arg0: i32, %arg1: i32) -> (i32, i32, i32) {
    %c0_i32 = arith.constant 0 : i32
    %c0_i32_0 = arith.constant 0 : i32
    return %arg0, %c0_i32, %arg1 : i32, i32, i32
  }
  func.func @transform_1(%arg0: i32, %arg1: i32) -> (i32, i32) {
    %c0_i32 = arith.constant 0 : i32
    %c0_i32_0 = arith.constant 0 : i32
    %c0_i32_1 = arith.constant 0 : i32
    return %c0_i32, %c0_i32_0 : i32, i32
  }
  func.func @transform_2(%arg0: i32, %arg1: i32) -> (i32, i32) {
    %c0_i32 = arith.constant 0 : i32
    %c0_i32_0 = arith.constant 0 : i32
    %c0_i32_1 = arith.constant 0 : i32
    return %c0_i32, %c0_i32_0 : i32, i32
  }
  func.func @transform_3(%arg0: i32, %arg1: i32) -> (i32, i32) {
    %c0_i32 = arith.constant 0 : i32
    %c0_i32_0 = arith.constant 0 : i32
    %c0_i32_1 = arith.constant 0 : i32
    return %c0_i32, %c0_i32_0 : i32, i32
  }
  func.func @transform_4(%arg0: i32, %arg1: i32) -> (i32, i32) {
    %c0_i32 = arith.constant 0 : i32
    %c0_i32_0 = arith.constant 0 : i32
    %c0_i32_1 = arith.constant 0 : i32
    return %c0_i32, %c0_i32_0 : i32, i32
  }
  func.func @transform_5(%arg0: i32, %arg1: i32) -> (i32, i32) {
    %c0_i32 = arith.constant 0 : i32
    %c0_i32_0 = arith.constant 0 : i32
    %c0_i32_1 = arith.constant 0 : i32
    return %c0_i32, %c0_i32_0 : i32, i32
  }
  func.func @transform_6(%arg0: i32, %arg1: i32) -> (i32, i32) {
    %c0_i32 = arith.constant 0 : i32
    %c0_i32_0 = arith.constant 0 : i32
    %c0_i32_1 = arith.constant 0 : i32
    return %c0_i32, %c0_i32_0 : i32, i32
  }
  func.func @transform_7(%arg0: i32, %arg1: i32) -> (i32, i32, i32) {
    %c0_i32 = arith.constant 0 : i32
    %c0_i32_0 = arith.constant 0 : i32
    return %arg0, %c0_i32, %arg1 : i32, i32, i32
  }
}

</mosaic_0001>

<bundles_post_ra>
// kernel: conv_3d_forward.1
= control target key start
LH: loop header
LB: loop body
LE: loop exit
PB: predicated region body
PF: predicated region fallthrough
CT: control target
= control target key end

     0   :  { %s768_s24 = smov 0   ;;  %s770_s25 = smov 0   ;;  %s855_s0 = inlined_call_operand.vmem [shape: f32[2,4,256], index: 0, kind: input, shape index: {}]   ;;  %s856_s1 = inlined_call_operand.vmem [shape: f32[16,4], index: 1, kind: input, shape index: {}]   ;;  %s857_s2 = inlined_call_operand.vmem [shape: f32[16,1], index: 2, kind: input, shape index: {}]   ;;  %s858_s3 = inlined_call_operand.vmem [shape: f32[32,16], index: 3, kind: input, shape index: {}]   ;;  %s859_s4 = inlined_call_operand.vmem [shape: f32[32,1], index: 4, kind: input, shape index: {}]   ;;  %s860_s5 = inlined_call_operand.vmem [shape: f32[8,32], index: 5, kind: input, shape index: {}]   ;;  %s861_s6 = inlined_call_operand.vmem [shape: f32[8,1], index: 6, kind: input, shape index: {}]   ;;  %s862_s7 = inlined_call_operand.vmem [shape: f32[2,8,256], index: 7, kind: output, shape index: {}]  }
   0x1   :  { %s772_s26 = smov 0  }
   0x2 LB: > { %s29_s27 = sadd.s32 1, %s721_s25  ;;  %p650_p0 = scmp.ge.s32.totalorder %s725_s26, 1  ;;  %s725_s26 = sphi %s772_s26, %s17_s26   ;;  %s721_s25 = sphi %s770_s25, %s864_s25   ;;  %s717_s24 = sphi %s768_s24, %s863_s24  }
   0x3   : > { %p31_p1 = scmp.ge.s32.totalorder %s29_s27, 2  ;;  %p258_p2 = scmp.lt.s32.totalorder %s725_s26, 3 }
   0x5   : > { %s866_s27 = smov (%p31_p1, %s29_s27), 0  ;;  %p259_p3 = pnand %p650_p0, %p258_p2 }
   0x6   : > { %p299_p4 = scmp.lt.s32.totalorder (!%p259_p3), %s717_s24, 1 }
   0x7   : > { %262 = sbr.rel (%p259_p3) target bundleno = 463 (0x1cf), region = 48 }
   0xc   : > { %v322_v0 = vld [vmem:[%s857_s2 + $0x8] sm:$0xff]  ;;  %v727_v1 = vmov 0   ;;  %s868_s24 = smov (!%p299_p4, %s717_s24), 1  ;;  %v321_v3 = vld [vmem:[%s857_s2] sm:$0xff]  ;;  %vm344_vm0 = vcmask 1043456   ;;  %vm337_vm1 = vcmask 31744  }
   0xd   : > { %700 = vset.pattern.permute.xlu0 %v727_v1  ;;  %701 = vset.pattern.permute.xlu1 %v727_v1  ;;  %s673_s30 = sshll.u32 %s868_s24, 3  ;;  %v319_v4 = vld [vmem:[%s856_s1] sm:$0xff]  ;;  %v320_v8 = vld [vmem:[%s856_s1 + $0x8] sm:$0xff]  ;;  %v406_v16 = vld [vmem:[%s859_s4 + $0x18] sm:$0xff]  ;;  %vm427_vm2 = vcmask 130048   ;;  %vm513_vm3 = vcmask 261120  }
   0xe   : > { %330 = vperm.xlu0 %700, %v322_v0   ;;  %702 = vset.pattern.permute.xlu2 %v727_v1  ;;  %s306_s10 = scalar_lea.vmem %s855_s0, %s673_s30  ;;  %v507_v7 = vld [vmem:[%s861_s6] sm:$0xff]  ;;  %v404_v17 = vld [vmem:[%s859_s4 + $0x8] sm:$0xff]  ;;  %v405_v26 = vld [vmem:[%s859_s4 + $0x10] sm:$0xff]  ;;  %s674_s18 = sshll.u32 %s868_s24, 4 }
   0xf   : > { %v318_v2 = vld [vmem:[%s306_s10] sm:$0xff]  ;;  %424 = vperm.xlu1 %701, %v406_v16   ;;  %414 = vperm.xlu2 %702, %v404_v17   ;;  %v400_v28 = vld [vmem:[%s858_s3 + $0x8] sm:$0xff]  ;;  %v401_v29 = vld [vmem:[%s858_s3 + $0x10] sm:$0xff]  ;;  %s316_s21 = scalar_lea.vmem %s862_s7, %s674_s18 }
  0x10   : > { %334 = vst [vmem:[#allocation1] ss:$2 sm:$0xff] %v318_v2  ;;  %v399_v25 = vld [vmem:[%s858_s3] sm:$0xff]  ;;  %v402_v30 = vld [vmem:[%s858_s3 + $0x18] sm:$0xff] }
  0x11   : > { %v403_v27 = vld [vmem:[%s859_s4] sm:$0xff] }
  0x12   : > { %v506_v59 = vld [vmem:[%s860_s5] sm:$0xff] }
  0x16   : > { %325 = vperm.xlu0 %700, %v321_v3  }
  0x17   : > { %v335_v5 = vld.sshfl [vmem:[#allocation1] sm:$0xff pattern:$0x75316420]  ;;  %v336_v6 = vld.sshfl [vmem:[#allocation1 + $0x8] sm:$0xff pattern:$0x75316420]  ;;  %419 = vperm.xlu1 %701, %v405_v26   ;;  %409 = vperm.xlu2 %702, %v403_v27  }
  0x18   : > { %655 = vmatpush.msk.msra.mxu0 %vm344_vm0, %v335_v5  ;;  %658 = vmatpush.msk.msra.mxu1 %vm344_vm0, %v336_v6 }
  0x19   : > { %656 = vmatmul.msk.f32.vlgmr.msra.gmra.mxu0 %vm337_vm1, %v319_v4  ;;  %659 = vmatmul.msk.f32.vlgmr.msra.gmra.mxu1 %vm337_vm1, %v319_v4 }
  0x1e   : > { %510 = vperm.xlu0 %700, %v507_v7  }
  0x21   : > { %657 = vmatmul.msk.f32.gmra.mxu0 %vm337_vm1, %v320_v8  ;;  %660 = vmatmul.msk.f32.gmra.mxu1 %vm337_vm1, %v320_v8 }
  0x69   : > { %v415_v36 = vpop.permute.xlu2 %414 }
  0x71   : > { %v410_v46 = vpop.permute.xlu2 %409 }
  0x80   : > { %v331_v9 = vpop.permute.xlu0 %330 }
  0x81   : > { %v425_v35 = vpop.permute.xlu1 %424 }
  0x88   : > { %v326_v12 = vpop.permute.xlu0 %325 }
  0x89   : > { %v420_v39 = vpop.permute.xlu1 %419 }
  0x90   : > { %v511_v60 = vpop.permute.xlu0 %510 }
  0x96   : > { %v366_v10 = vpop.f32.mrf.mxu0  ;;  %v389_v11 = vpop.f32.mrf.mxu1 }
  0x97   : > { %v367_v13 = vadd.f32 %v366_v10, %v326_v12  ;;  %v390_v18 = vadd.f32 %v389_v11, %v326_v12 }
  0x99   : > { %v395_v23 = vmax.f32 %v367_v13, 0.0  ;;  %v396_v24 = vmax.f32 %v390_v18, 0.0 }
  0x9e   : > { %v369_v14 = vpop.f32.mrf.mxu0  ;;  %v392_v15 = vpop.f32.mrf.mxu1 }
  0x9f   : > { %v370_v19 = vadd.f32 %v369_v14, %v331_v9  ;;  %v393_v20 = vadd.f32 %v392_v15, %v331_v9 }
  0xa1   : > { %v397_v21 = vmax.f32 %v370_v19, 0.0  ;;  %v398_v22 = vmax.f32 %v393_v20, 0.0 }
  0xa3   : > { %454 = vmatpush.msra.mxu2 %v397_v21  ;;  %483 = vmatpush.msra.mxu3 %v398_v22 }
  0xa5   : > { %455 = vmatpush.msra.mxu2 %v395_v23  ;;  %484 = vmatpush.msra.mxu3 %v396_v24 }
  0xa6   : > { %661 = vmatmul.msk.f32.vlgmr.msra.gmra.mxu2 %vm427_vm2, %v399_v25  ;;  %665 = vmatmul.msk.f32.vlgmr.msra.gmra.mxu3 %vm427_vm2, %v399_v25 }
  0xae   : > { %662 = vmatmul.msk.f32.gmra.mxu2 %vm427_vm2, %v400_v28  ;;  %666 = vmatmul.msk.f32.gmra.mxu3 %vm427_vm2, %v400_v28 }
  0xb6   : > { %663 = vmatmul.msk.f32.gmra.mxu2 %vm427_vm2, %v401_v29  ;;  %667 = vmatmul.msk.f32.gmra.mxu3 %vm427_vm2, %v401_v29 }
  0xbe   : > { %664 = vmatmul.msk.f32.gmra.mxu2 %vm427_vm2, %v402_v30  ;;  %668 = vmatmul.msk.f32.gmra.mxu3 %vm427_vm2, %v402_v30 }
 0x129   : > { %v457_v31 = vpop.f32.mrf.mxu2  ;;  %v486_v32 = vpop.f32.mrf.mxu3 }
 0x12a   : > { %v458_v51 = vadd.f32 %v457_v31, %v410_v46  ;;  %v487_v52 = vadd.f32 %v486_v32, %v410_v46 }
 0x12c   : > { %v498_v57 = vmax.f32 %v458_v51, 0.0  ;;  %v499_v58 = vmax.f32 %v487_v52, 0.0 }
 0x131   : > { %v460_v33 = vpop.f32.mrf.mxu2  ;;  %v489_v34 = vpop.f32.mrf.mxu3 }
 0x132   : > { %v461_v47 = vadd.f32 %v460_v33, %v415_v36  ;;  %v490_v48 = vadd.f32 %v489_v34, %v415_v36 }
 0x134   : > { %v500_v55 = vmax.f32 %v461_v47, 0.0  ;;  %v501_v56 = vmax.f32 %v490_v48, 0.0 }
 0x139   : > { %v463_v37 = vpop.f32.mrf.mxu2  ;;  %v492_v38 = vpop.f32.mrf.mxu3 }
 0x13a   : > { %v464_v42 = vadd.f32 %v463_v37, %v420_v39  ;;  %v493_v43 = vadd.f32 %v492_v38, %v420_v39 }
 0x13c   : > { %v502_v53 = vmax.f32 %v464_v42, 0.0  ;;  %v503_v54 = vmax.f32 %v493_v43, 0.0 }
 0x141   : > { %v466_v40 = vpop.f32.mrf.mxu2  ;;  %v495_v41 = vpop.f32.mrf.mxu3 }
 0x142   : > { %v467_v44 = vadd.f32 %v466_v40, %v425_v35  ;;  %v496_v45 = vadd.f32 %v495_v41, %v425_v35 }
 0x144   : > { %v504_v49 = vmax.f32 %v467_v44, 0.0  ;;  %v505_v50 = vmax.f32 %v496_v45, 0.0 }
 0x146   : > { %529 = vmatpush.msrb.mxu0 %v504_v49  ;;  %549 = vmatpush.msrb.mxu1 %v505_v50 }
 0x148   : > { %530 = vmatpush.msrb.mxu0 %v502_v53  ;;  %550 = vmatpush.msrb.mxu1 %v503_v54 }
 0x14a   : > { %531 = vmatpush.msrb.mxu0 %v500_v55  ;;  %551 = vmatpush.msrb.mxu1 %v501_v56 }
 0x14c   : > { %532 = vmatpush.msrb.mxu0 %v498_v57  ;;  %552 = vmatpush.msrb.mxu1 %v499_v58 }
 0x14d   : > { %669 = vmatmul.msk.f32.vlgmr.msrb.gmra.mxu0 %vm513_vm3, %v506_v59  ;;  %670 = vmatmul.msk.f32.vlgmr.msrb.gmra.mxu1 %vm513_vm3, %v506_v59 }
 0x1ca   : > { %v534_v61 = vpop.f32.mrf.mxu0  ;;  %v554_v62 = vpop.f32.mrf.mxu1 }
 0x1cb   : > { %v535_v63 = vadd.f32 %v534_v61, %v511_v60  ;;  %v555_v0 = vadd.f32 %v554_v62, %v511_v60 }
 0x1cd   : > { %557 = vst [vmem:[%s316_s21] sm:$0xff] %v535_v63 }
 0x1ce   : > { %558 = vst [vmem:[%s316_s21 + $0x8] sm:$0xff] %v555_v0 }
 0x1cf PF: > { %s17_s26 = sadd.s32 1, %s725_s26   ;;  %s863_s24 = smov %s721_s25 }
 0x1d0   : > { %p14_p5 = scmp.ge.s32.totalorder %s17_s26, 4   ;;  %s864_s25 = smov %s866_s27 }
 0x1d2   :  { %16 = sbr.rel (!%p14_p5) target bundleno = 2 (0x2), region = 78 }

</bundles_post_ra>
